<compile_context>
chip_gen: v6e
topology: v6e:2x2x1
jax: 0.10.0
libtpu: 0.0.40
codegen_flags: <defaults>
</compile_context>

<pallas_src>
import functools

import jax
import jax.numpy as jnp
from jax.experimental import pallas as pl
from jax.experimental.pallas import tpu as pltpu


def _round_up(x, m):
    return ((x + m - 1) // m) * m


def _sage_layer_kernel(adj_ref, xk_ref, xi_ref, w_ref, b_ref, o_ref,
                       acc_ref, deg_ref, fused_ref, *, apply_relu, f_in_p):
    """One SAGEConv layer tile.

    grid = (dst-row tiles, contraction tiles over src nodes); axis 1 (k) is the
    reduction axis.  acc_ref accumulates A_tile @ X_tile (f32), deg_ref the
    in-degree of the tile's dst rows.  On the last k step the mean aggregate is
    formed, the self/neighbor projections run as one fused MXU matmul and the
    result (+ bias, optional ReLU) is stored lane-dense.
    """
    k = pl.program_id(1)

    @pl.when(k == 0)
    def _init():
        acc_ref[...] = jnp.zeros_like(acc_ref)
        deg_ref[...] = jnp.zeros_like(deg_ref)

    a = adj_ref[...]                                   # (tm, tk) bf16, entries 0/1
    acc_ref[...] += jnp.dot(a, xk_ref[...], preferred_element_type=jnp.float32)
    deg_ref[...] += jnp.sum(a.astype(jnp.float32), axis=-1, keepdims=True)

    @pl.when(k == pl.num_programs(1) - 1)
    def _finalize():
        deg = deg_ref[...]                             # (tm, 1) f32, in-degree
        inv_deg = jnp.where(deg > 0.0, 1.0 / jnp.maximum(deg, 1.0), 0.0)
        neigh = acc_ref[...] * inv_deg                 # (tm, f_in_p) mean aggregate
        # Fused [x | neigh] @ [W_self ; W_neigh]: one MXU call with K = 2*f_in_p.
        fused_ref[:, :f_in_p] = xi_ref[...]
        fused_ref[:, f_in_p:] = neigh.astype(fused_ref.dtype)
        out = jnp.dot(fused_ref[...], w_ref[...],
                      preferred_element_type=jnp.float32) + b_ref[...]
        if apply_relu:
            out = jnp.maximum(out, 0.0)
        o_ref[...] = out.astype(o_ref.dtype)


def sage_layer(adj_p, x_p, w_self, w_neigh, bias, *, apply_relu, tm, tk):
    """adj_p: (n_p, n_p) bf16 with 0/1 entries; x_p: (n_p, f_in_p) bf16 (padded).

    Returns (n_p, f_out_p) f32; padded output columns are exactly zero.
    """
    n_p = adj_p.shape[0]
    f_in_p = x_p.shape[1]
    f_in, f_out = w_self.shape
    f_out_p = _round_up(f_out, 128)

    # Stacked projection weights: rows [0, f_in) -> self path,
    # rows [f_in_p, f_in_p + f_in) -> neighbor path; all padding rows are zero.
    w_stack = jnp.zeros((2 * f_in_p, f_out_p), jnp.float32)
    w_stack = w_stack.at[:f_in, :f_out].set(w_self)
    w_stack = w_stack.at[f_in_p:f_in_p + f_in, :f_out].set(w_neigh)
    w_stack = w_stack.astype(jnp.bfloat16)
    b_p = jnp.zeros((1, f_out_p), jnp.float32).at[:, :f_out].set(bias)

    grid = (n_p // tm, n_p // tk)
    kernel = functools.partial(_sage_layer_kernel,
                               apply_relu=apply_relu, f_in_p=f_in_p)

    return pl.pallas_call(
        kernel,
        out_shape=jax.ShapeDtypeStruct((n_p, f_out_p), jnp.float32),
        grid_spec=pltpu.PrefetchScalarGridSpec(
            num_scalar_prefetch=0,
            grid=grid,
            in_specs=[
                pl.BlockSpec((tm, tk), lambda i, k: (i, k)),               # A[dst, src]
                pl.BlockSpec((tk, f_in_p), lambda i, k: (k, 0)),           # X src rows
                pl.BlockSpec((tm, f_in_p), lambda i, k: (i, 0)),           # X dst rows
                pl.BlockSpec((2 * f_in_p, f_out_p), lambda i, k: (0, 0)),  # [Wself;Wneigh]
                pl.BlockSpec((1, f_out_p), lambda i, k: (0, 0)),           # bias
            ],
            out_specs=pl.BlockSpec((tm, f_out_p), lambda i, k: (i, 0)),
            scratch_shapes=[
                pltpu.VMEM((tm, f_in_p), jnp.float32),        # A @ X accumulator
                pltpu.VMEM((tm, 1), jnp.float32),             # in-degree accumulator
                pltpu.VMEM((tm, 2 * f_in_p), jnp.bfloat16),   # fused [x | neigh]
            ],
        ),
        compiler_params=pltpu.CompilerParams(
            dimension_semantics=("parallel", "arbitrary")),
    )(adj_p, x_p, x_p, w_stack, b_p)


def sage_forward(adj, x, params):
    """Two SAGEConv layers (mean aggregator), ReLU in between."""
    n, f_in = x.shape
    f_out = params["w_self2"].shape[1]

    # Pad nodes to a tile multiple and features to lane-dense multiples of 128.
    n_p = _round_up(n, 128)
    tile = min(256, n_p)                       # fits comfortably in VMEM on v5e/v6e/v7x
    n_p = _round_up(n_p, tile)
    f_in_p = _round_up(f_in, 128)

    adj_p = jnp.zeros((n_p, n_p), jnp.float32).at[:n, :n].set(adj).astype(jnp.bfloat16)
    x_p = jnp.zeros((n_p, f_in_p), jnp.float32).at[:n, :f_in].set(x).astype(jnp.bfloat16)

    h = sage_layer(adj_p, x_p,
                   params["w_self1"], params["w_neigh1"], params["b1"],
                   apply_relu=True, tm=tile, tk=tile)          # conv1 + ReLU
    h = sage_layer(adj_p, h.astype(jnp.bfloat16),
                   params["w_self2"], params["w_neigh2"], params["b2"],
                   apply_relu=False, tm=tile, tk=tile)         # conv2
    return h[:n, :f_out]


def sage_reference(adj, x, params):
    """Pure-JAX f32 reference (DGL SAGEConv 'mean' semantics)."""
    deg = jnp.sum(adj, axis=1, keepdims=True)
    a_norm = jnp.where(deg > 0, adj / jnp.maximum(deg, 1.0), 0.0)

    def layer(h, ws, wn, b):
        return h @ ws + (a_norm @ h) @ wn + b

    h = jax.nn.relu(layer(x, params["w_self1"], params["w_neigh1"], params["b1"]))
    return layer(h, params["w_self2"], params["w_neigh2"], params["b2"])


def init_params(key, in_feats, hid_feats, out_feats):
    k = jax.random.split(key, 6)
    s1 = 1.0 / jnp.sqrt(in_feats)
    s2 = 1.0 / jnp.sqrt(hid_feats)
    return {
        "w_self1":  jax.random.uniform(k[0], (in_feats, hid_feats), jnp.float32, -s1, s1),
        "w_neigh1": jax.random.uniform(k[1], (in_feats, hid_feats), jnp.float32, -s1, s1),
        "b1":       jax.random.uniform(k[2], (1, hid_feats), jnp.float32, -s1, s1),
        "w_self2":  jax.random.uniform(k[3], (hid_feats, out_feats), jnp.float32, -s2, s2),
        "w_neigh2": jax.random.uniform(k[4], (hid_feats, out_feats), jnp.float32, -s2, s2),
        "b2":       jax.random.uniform(k[5], (1, out_feats), jnp.float32, -s2, s2),
    }


if __name__ == "__main__":
    # small, deterministic example graph + features
    N_NODES, IN_FEATS, HID_FEATS, OUT_FEATS = 16, 16, 32, 8

    key = jax.random.PRNGKey(0)
    k_adj, k_x, k_p = jax.random.split(key, 3)

    # random directed graph: adj[dst, src] = 1 with p=0.3 (self-loops removed)
    adj = jax.random.bernoulli(k_adj, 0.3, (N_NODES, N_NODES)).astype(jnp.float32)
    adj = adj * (1.0 - jnp.eye(N_NODES, dtype=jnp.float32))

    x = jax.random.normal(k_x, (N_NODES, IN_FEATS), jnp.float32)
    params = init_params(k_p, IN_FEATS, HID_FEATS, OUT_FEATS)

    out = jax.block_until_ready(sage_forward(adj, x, params))
    assert out.shape == (N_NODES, OUT_FEATS)

    # loose tolerance: adjacency/activations stream through the MXU as bf16
    ref = sage_reference(adj, x, params)
    assert jnp.allclose(out, ref, rtol=7.5e-2, atol=7.5e-2), \
        float(jnp.max(jnp.abs(out - ref)))
    print("KERNEL_OK")
</pallas_src>

<mosaic_0001>
module attributes {stable_mosaic.version = 11 : i64} {
  func.func @_sage_layer_kernel(%arg0: i32, %arg1: i32, %arg2: memref<128x128xbf16, #tpu.memory_space<vmem>>, %arg3: memref<128x128xbf16, #tpu.memory_space<vmem>>, %arg4: memref<128x128xbf16, #tpu.memory_space<vmem>>, %arg5: memref<256x128xbf16, #tpu.memory_space<vmem>>, %arg6: memref<1x128xf32, #tpu.memory_space<vmem>>, %arg7: memref<128x128xf32, #tpu.memory_space<vmem>>, %arg8: memref<128x128xf32, #tpu.memory_space<vmem>>, %arg9: memref<128x1xf32, #tpu.memory_space<vmem>>, %arg10: memref<128x256xbf16, #tpu.memory_space<vmem>>) attributes {dimension_semantics = [#tpu.dimension_semantics<parallel>, #tpu.dimension_semantics<arbitrary>], iteration_bounds = array<i64: 1, 1>, scalar_prefetch = 0 : i64, scratch_operands = 3 : i64, tpu.core_type = #tpu.core_type<tc>, window_params = [{transform_indices = @transform_0, window_bounds = array<i64: 128, 128>}, {transform_indices = @transform_1, window_bounds = array<i64: 128, 128>}, {transform_indices = @transform_2, window_bounds = array<i64: 128, 128>}, {pipeline_mode = #tpu.pipeline_mode<synchronous>, transform_indices = @transform_3, window_bounds = array<i64: 256, 128>}, {pipeline_mode = #tpu.pipeline_mode<synchronous>, transform_indices = @transform_4, window_bounds = array<i64: 1, 128>}, {transform_indices = @transform_5, window_bounds = array<i64: 128, 128>}]} {
    %c0_i32 = arith.constant 0 : i32
    %0 = arith.cmpi eq, %arg1, %c0_i32 : i32
    %1 = arith.extui %0 : i1 to i32
    %c0_i32_0 = arith.constant 0 : i32
    %2 = arith.cmpi ne, %1, %c0_i32_0 : i32
    scf.if %2 {
      %cst_15 = arith.constant 0.000000e+00 : f32
      %18 = vector.broadcast %cst_15 : f32 to vector<128x128xf32>
      %c0_16 = arith.constant 0 : index
      %c0_17 = arith.constant 0 : index
      %19 = vector.load %arg8[%c0_16, %c0_17] : memref<128x128xf32, #tpu.memory_space<vmem>>, vector<128x128xf32>
      tpu.vector_store %arg8[%c0_16, %c0_17], %18 {strides = array<i32>} : memref<128x128xf32, #tpu.memory_space<vmem>>, vector<128x128xf32>,
      %cst_18 = arith.constant 0.000000e+00 : f32
      %20 = vector.broadcast %cst_18 : f32 to vector<128x1xf32>
      %c0_19 = arith.constant 0 : index
      %c0_20 = arith.constant 0 : index
      %21 = vector.load %arg9[%c0_19, %c0_20] : memref<128x1xf32, #tpu.memory_space<vmem>>, vector<128x1xf32>
      tpu.vector_store %arg9[%c0_19, %c0_20], %20 {strides = array<i32>} : memref<128x1xf32, #tpu.memory_space<vmem>>, vector<128x1xf32>,
    } else {
    }
    %c0 = arith.constant 0 : index
    %c0_1 = arith.constant 0 : index
    %3 = vector.load %arg2[%c0, %c0_1] : memref<128x128xbf16, #tpu.memory_space<vmem>>, vector<128x128xbf16>
    %c0_2 = arith.constant 0 : index
    %c0_3 = arith.constant 0 : index
    %4 = vector.load %arg8[%c0_2, %c0_3] : memref<128x128xf32, #tpu.memory_space<vmem>>, vector<128x128xf32>
    %c0_4 = arith.constant 0 : index
    %c0_5 = arith.constant 0 : index
    %5 = vector.load %arg3[%c0_4, %c0_5] : memref<128x128xbf16, #tpu.memory_space<vmem>>, vector<128x128xbf16>
    %cst = arith.constant dense<0.000000e+00> : vector<128x128xf32>
    %6 = tpu.matmul %3, %5, %cst {dimension_numbers = #tpu.dot_dimension_numbers<[1], [0], [0], [1], [0, 0, 1, 1], [], []>} : vector<128x128xbf16>, vector<128x128xbf16>, vector<128x128xf32> -> vector<128x128xf32>
    %7 = arith.addf %4, %6 : vector<128x128xf32>
    %c0_6 = arith.constant 0 : index
    %c0_7 = arith.constant 0 : index
    %8 = vector.load %arg8[%c0_6, %c0_7] : memref<128x128xf32, #tpu.memory_space<vmem>>, vector<128x128xf32>
    tpu.vector_store %arg8[%c0_6, %c0_7], %7 {strides = array<i32>} : memref<128x128xf32, #tpu.memory_space<vmem>>, vector<128x128xf32>,
    %c0_8 = arith.constant 0 : index
    %c0_9 = arith.constant 0 : index
    %9 = vector.load %arg9[%c0_8, %c0_9] : memref<128x1xf32, #tpu.memory_space<vmem>>, vector<128x1xf32>
    %10 = arith.extf %3 : vector<128x128xbf16> to vector<128x128xf32>
    %cst_10 = arith.constant dense<0.000000e+00> : vector<128xf32>
    %11 = vector.multi_reduction <add>, %10, %cst_10 [1] : vector<128x128xf32> to vector<128xf32>
    %12 = vector.shape_cast %11 : vector<128xf32> to vector<128x1xf32>
    %13 = arith.addf %9, %12 : vector<128x1xf32>
    %c0_11 = arith.constant 0 : index
    %c0_12 = arith.constant 0 : index
    %14 = vector.load %arg9[%c0_11, %c0_12] : memref<128x1xf32, #tpu.memory_space<vmem>>, vector<128x1xf32>
    tpu.vector_store %arg9[%c0_11, %c0_12], %13 {strides = array<i32>} : memref<128x1xf32, #tpu.memory_space<vmem>>, vector<128x1xf32>,
    %c0_i32_13 = arith.constant 0 : i32
    %15 = arith.cmpi eq, %arg1, %c0_i32_13 : i32
    %16 = arith.extui %15 : i1 to i32
    %c0_i32_14 = arith.constant 0 : i32
    %17 = arith.cmpi ne, %16, %c0_i32_14 : i32
    scf.if %17 {
      %c0_15 = arith.constant 0 : index
      %c0_16 = arith.constant 0 : index
      %18 = vector.load %arg9[%c0_15, %c0_16] : memref<128x1xf32, #tpu.memory_space<vmem>>, vector<128x1xf32>
      %cst_17 = arith.constant 0.000000e+00 : f32
      %19 = vector.broadcast %cst_17 : f32 to vector<128x1xf32>
      %20 = arith.cmpf ogt, %18, %19 : vector<128x1xf32>
      %cst_18 = arith.constant 1.000000e+00 : f32
      %21 = vector.broadcast %cst_18 : f32 to vector<128x1xf32>
      %22 = arith.maximumf %18, %21 : vector<128x1xf32>
      %cst_19 = arith.constant 1.000000e+00 : f32
      %23 = vector.broadcast %cst_19 : f32 to vector<128x1xf32>
      %24 = arith.divf %23, %22 : vector<128x1xf32>
      %cst_20 = arith.constant 0.000000e+00 : f32
      %25 = vector.broadcast %cst_20 : f32 to vector<128x1xf32>
      %26 = arith.select %20, %24, %25 : vector<128x1xi1>, vector<128x1xf32>
      %c0_21 = arith.constant 0 : index
      %c0_22 = arith.constant 0 : index
      %27 = vector.load %arg8[%c0_21, %c0_22] : memref<128x128xf32, #tpu.memory_space<vmem>>, vector<128x128xf32>
      %28 = vector.broadcast %26 : vector<128x1xf32> to vector<128x128xf32>
      %29 = arith.mulf %27, %28 : vector<128x128xf32>
      %c0_23 = arith.constant 0 : index
      %c0_24 = arith.constant 0 : index
      %30 = vector.load %arg4[%c0_23, %c0_24] : memref<128x128xbf16, #tpu.memory_space<vmem>>, vector<128x128xbf16>
      %c0_25 = arith.constant 0 : index
      %c0_26 = arith.constant 0 : index
      %31 = vector.load %arg10[%c0_25, %c0_26] : memref<128x256xbf16, #tpu.memory_space<vmem>>, vector<128x128xbf16>
      tpu.vector_store %arg10[%c0_25, %c0_26], %30 {strides = array<i32>} : memref<128x256xbf16, #tpu.memory_space<vmem>>, vector<128x128xbf16>,
      %32 = arith.truncf %29 : vector<128x128xf32> to vector<128x128xbf16>
      %c0_27 = arith.constant 0 : index
      %c128 = arith.constant 128 : index
      %33 = vector.load %arg10[%c0_27, %c128] : memref<128x256xbf16, #tpu.memory_space<vmem>>, vector<128x128xbf16>
      tpu.vector_store %arg10[%c0_27, %c128], %32 {strides = array<i32>} : memref<128x256xbf16, #tpu.memory_space<vmem>>, vector<128x128xbf16>,
      %c0_28 = arith.constant 0 : index
      %c0_29 = arith.constant 0 : index
      %34 = vector.load %arg10[%c0_28, %c0_29] : memref<128x256xbf16, #tpu.memory_space<vmem>>, vector<128x256xbf16>
      %c0_30 = arith.constant 0 : index
      %c0_31 = arith.constant 0 : index
      %35 = vector.load %arg5[%c0_30, %c0_31] : memref<256x128xbf16, #tpu.memory_space<vmem>>, vector<256x128xbf16>
      %cst_32 = arith.constant dense<0.000000e+00> : vector<128x128xf32>
      %36 = tpu.matmul %34, %35, %cst_32 {dimension_numbers = #tpu.dot_dimension_numbers<[1], [0], [0], [1], [0, 0, 1, 1], [], []>} : vector<128x256xbf16>, vector<256x128xbf16>, vector<128x128xf32> -> vector<128x128xf32>
      %c0_33 = arith.constant 0 : index
      %c0_34 = arith.constant 0 : index
      %37 = vector.load %arg6[%c0_33, %c0_34] : memref<1x128xf32, #tpu.memory_space<vmem>>, vector<1x128xf32>
      %38 = vector.broadcast %37 : vector<1x128xf32> to vector<128x128xf32>
      %39 = arith.addf %36, %38 : vector<128x128xf32>
      %cst_35 = arith.constant 0.000000e+00 : f32
      %40 = vector.broadcast %cst_35 : f32 to vector<128x128xf32>
      %41 = arith.maximumf %39, %40 : vector<128x128xf32>
      %c0_36 = arith.constant 0 : index
      %c0_37 = arith.constant 0 : index
      %42 = vector.load %arg7[%c0_36, %c0_37] : memref<128x128xf32, #tpu.memory_space<vmem>>, vector<128x128xf32>
      tpu.vector_store %arg7[%c0_36, %c0_37], %41 {strides = array<i32>} : memref<128x128xf32, #tpu.memory_space<vmem>>, vector<128x128xf32>,
    } else {
    }
    return
  }
  func.func @transform_0(%arg0: i32, %arg1: i32) -> (i32, i32) {
    %c0_i32 = arith.constant 0 : i32
    return %arg0, %arg1 : i32, i32
  }
  func.func @transform_1(%arg0: i32, %arg1: i32) -> (i32, i32) {
    %c0_i32 = arith.constant 0 : i32
    %c0_i32_0 = arith.constant 0 : i32
    return %arg1, %c0_i32 : i32, i32
  }
  func.func @transform_2(%arg0: i32, %arg1: i32) -> (i32, i32) {
    %c0_i32 = arith.constant 0 : i32
    %c0_i32_0 = arith.constant 0 : i32
    return %arg0, %c0_i32 : i32, i32
  }
  func.func @transform_3(%arg0: i32, %arg1: i32) -> (i32, i32) {
    %c0_i32 = arith.constant 0 : i32
    %c0_i32_0 = arith.constant 0 : i32
    %c0_i32_1 = arith.constant 0 : i32
    return %c0_i32, %c0_i32_0 : i32, i32
  }
  func.func @transform_4(%arg0: i32, %arg1: i32) -> (i32, i32) {
    %c0_i32 = arith.constant 0 : i32
    %c0_i32_0 = arith.constant 0 : i32
    %c0_i32_1 = arith.constant 0 : i32
    return %c0_i32, %c0_i32_0 : i32, i32
  }
  func.func @transform_5(%arg0: i32, %arg1: i32) -> (i32, i32) {
    %c0_i32 = arith.constant 0 : i32
    %c0_i32_0 = arith.constant 0 : i32
    return %arg0, %c0_i32 : i32, i32
  }
}

</mosaic_0001>

<bundles_post_ra>
// kernel: tpu_custom_call.1
= control target key start
LH: loop header
LB: loop body
LE: loop exit
PB: predicated region body
PF: predicated region fallthrough
CT: control target
= control target key end

     0   :  { %10 = vsyncpa [#allocation6], 0  ;;  %s1809_s0 = inlined_call_operand.hbm [shape: bf16[128,128], index: 0, kind: input, shape index: {}]   ;;  %s1810_s1 = inlined_call_operand.hbm [shape: bf16[128,128], index: 1, kind: input, shape index: {}]   ;;  %s1811_s2 = inlined_call_operand.hbm [shape: bf16[128,128], index: 2, kind: input, shape index: {}]   ;;  %s1812_s3 = inlined_call_operand.hbm [shape: bf16[256,128], index: 3, kind: input, shape index: {}]   ;;  %s1813_s4 = inlined_call_operand.vmem [shape: f32[1,128], index: 4, kind: input, shape index: {}]   ;;  %s1814_s5 = inlined_call_operand.hbm [shape: f32[128,128], index: 5, kind: output, shape index: {}]  }
   0x1   :  { %11 = vsyncpa [#allocation9], 0 }
   0x2   :  { %12 = vsyncpa [#allocation12], 0 }
   0x3   :  { %13 = vsyncpa [#allocation7], 0  ;;  %s1612_s18 = smov [#allocation8]   ;;  %s1613_s20 = smov [#allocation5]  }
   0x4   :  { %s31_s19 = sshll.u32 %s1612_s18, 4  ;;  %s19_s21 = sshll.u32 %s1613_s20, 4  ;;  %s32_s19 = int_to_ptr.vmem [resolvable:$true] %s31_s19  ;;  %s20_s21 = int_to_ptr.vmem [resolvable:$true] %s19_s21 }
   0x5   :  { %s1512_s22 = scalar_lea.vmem %s32_s19, 1024  ;;  %p1517_p1 = scmp.lt.s32.totalorder %s32_s19, %s32_s19 }
   0x6   :  { %p1513_p0 = scmp.ne.s32.totalorder %s32_s19, %s1512_s22  ;;  %p1518_p2 = scmp.lt.s32.totalorder %s1512_s22, %s1512_s22 }
   0x8   :  { %p1519_p3 = por %p1518_p2, %p1517_p1 }
   0xa   :  { %p1520_p4 = pnand %p1519_p3, %p1513_p0 }
   0xc   :  { %1523 = shalt.err (!%p1520_p4)
}
   0xd   :  { %s1614_s23 = smov 64   ;;  %s1615_s24 = smov 4  }
   0xe   :  { %37 = dma.hbm_to_vmem [thread:$0]  %s1810_s1, 1024, %s32_s19, [#allocation9], %s1614_s23, %s1614_s23, %s1615_s24  }
   0xf   :  { %s1532_s27 = scalar_lea.vmem %s20_s21, 1024  ;;  %p1537_p6 = scmp.lt.s32.totalorder %s20_s21, %s20_s21 }
  0x10   :  { %p1533_p5 = scmp.ne.s32.totalorder %s20_s21, %s1532_s27  ;;  %p1538_p7 = scmp.lt.s32.totalorder %s1532_s27, %s1532_s27 }
  0x12   :  { %p1539_p8 = por %p1538_p7, %p1537_p6 }
  0x14   :  { %p1540_p9 = pnand %p1539_p8, %p1533_p5 }
  0x16   :  { %1543 = shalt.err (!%p1540_p9)
}
  0x17   :  { %25 = dma.hbm_to_vmem [thread:$0]  %s1809_s0, 1024, %s20_s21, [#allocation6], %s1614_s23, %s1614_s23, %s1615_s24  }
  0x18   :  { %s1616_s30 = smov [#allocation10]   ;;  %s1617_s7 = smov [#allocation11]  }
  0x19   :  { %s43_s6 = sshll.u32 %s1616_s30, 4  ;;  %s55_s8 = sshll.u32 %s1617_s7, 4  ;;  %s44_s6 = int_to_ptr.vmem [resolvable:$true] %s43_s6  ;;  %s56_s8 = int_to_ptr.vmem [resolvable:$true] %s55_s8 }
  0x1a   :  { %s1552_s1 = scalar_lea.vmem %s44_s6, 1024  ;;  %p1557_p11 = scmp.lt.s32.totalorder %s44_s6, %s44_s6 }
  0x1b   :  { %p1553_p10 = scmp.ne.s32.totalorder %s44_s6, %s1552_s1  ;;  %p1558_p12 = scmp.lt.s32.totalorder %s1552_s1, %s1552_s1 }
  0x1d   :  { %p1559_p13 = por %p1558_p12, %p1557_p11 }
  0x1f   :  { %p1560_p0 = pnand %p1559_p13, %p1553_p10 }
  0x21   :  { %1563 = shalt.err (!%p1560_p0)
}
  0x22   :  { %49 = dma.hbm_to_vmem [thread:$0]  %s1811_s2, 1024, %s44_s6, [#allocation9], %s1614_s23, %s1614_s23, %s1615_s24  }
  0x23   :  { %s1572_s0 = scalar_lea.vmem %s56_s8, 2048  ;;  %p1577_p2 = scmp.lt.s32.totalorder %s56_s8, %s56_s8 }
  0x24   :  { %p1573_p1 = scmp.ne.s32.totalorder %s56_s8, %s1572_s0  ;;  %p1578_p3 = scmp.lt.s32.totalorder %s1572_s0, %s1572_s0 }
  0x26   :  { %p1579_p4 = por %p1578_p3, %p1577_p2 }
  0x28   :  { %p1580_p5 = pnand %p1579_p4, %p1573_p1 }
  0x2a   :  { %1583 = shalt.err (!%p1580_p5)
}
  0x2b   :  { %61 = dma.hbm_to_vmem [thread:$0]  %s1812_s3, 2048, %s56_s8, [#allocation12], %s1614_s23, %s1614_s23, %s1615_s24  }
  0x2c   :  { %1604 = dma.done.wait [#allocation6], 1024  }
  0x2d   :  { %1605 = vsyncadd [#allocation6], 4294966272 }
  0x2e   :  { %1606 = dma.done.wait [#allocation9], 2048  }
  0x2f   :  { %1607 = vsyncadd [#allocation9], 4294965248 }
  0x30   :  { %1608 = dma.done.wait [#allocation12], 2048  }
  0x31   :  { %1609 = vsyncadd [#allocation12], 4294965248  ;;  %vm97_vm0 = vcmask 7168   ;;  %v1618_v0 = vmov 0.0   ;;  %v1693_v1 = vld [vmem:[#allocation5 + $0x18] sm:$0xff]   ;;  %v1695_v2 = vld [vmem:[#allocation5 + $0x10] sm:$0xff]  }
  0x32   :  { %104 = vst.msk [vmem:[#allocation3 + $0x30] sm:$0xff] %vm97_vm0, %v1618_v0  ;;  %98 = vst.msk [vmem:[#allocation3] sm:$0xff] %vm97_vm0, %v1618_v0  ;;  %v409_v3 = vunpack.c.l.bf16 %v1693_v1  ;;  %v407_v4 = vunpack.c.l.bf16 %v1695_v2  ;;  %v1699_v5 = vld [vmem:[#allocation5 + $0x20] sm:$0xff]   ;;  %v410_v6 = vunpack.c.h.bf16 %v1693_v1  ;;  %v408_v7 = vunpack.c.h.bf16 %v1695_v2  ;;  %v1415_v8 = vld [vmem:[#allocation8 + $0x38] sm:$0xff]  }
  0x33   :  { %99 = vst.msk [vmem:[#allocation3 + $0x8] sm:$0xff] %vm97_vm0, %v1618_v0  ;;  %100 = vst.msk [vmem:[#allocation3 + $0x10] sm:$0xff] %vm97_vm0, %v1618_v0  ;;  %v1416_v9 = vld [vmem:[#allocation8 + $0x30] sm:$0xff]   ;;  %v115_v10 = vld [vmem:[#allocation5] sm:$0xff]   ;;  %1347 = vmatprep.subr.bf16.mxu0 %v1415_v8  ;;  %v412_v11 = vunpack.c.h.bf16 %v1699_v5  ;;  %v411_v12 = vunpack.c.l.bf16 %v1699_v5  ;;  %v1619_v33 = vmov 0  }
  0x34   :  { %101 = vst.msk [vmem:[#allocation3 + $0x18] sm:$0xff] %vm97_vm0, %v1618_v0  ;;  %102 = vst.msk [vmem:[#allocation3 + $0x20] sm:$0xff] %vm97_vm0, %v1618_v0  ;;  %431 = vadd.xlane.f32.xlu1 %v409_v3  ;;  %427 = vadd.xlane.f32.xlu0 %v407_v4  ;;  %v125_v13 = vld [vmem:[#allocation5 + $0x28] sm:$0xff]   ;;  %v1418_v17 = vld [vmem:[#allocation8 + $0x20] sm:$0xff]   ;;  %v404_v18 = vunpack.c.h.bf16 %v115_v10  ;;  %v403_v19 = vunpack.c.l.bf16 %v115_v10 }
  0x35   :  { %103 = vst.msk [vmem:[#allocation3 + $0x28] sm:$0xff] %vm97_vm0, %v1618_v0  ;;  %105 = vst.msk [vmem:[#allocation3 + $0x38] sm:$0xff] %vm97_vm0, %v1618_v0  ;;  %1348 = vmatpush3.bf16.msra.mxu0 %v1415_v8  ;;  %v1417_v14 = vld [vmem:[#allocation8 + $0x28] sm:$0xff]   ;;  %1363 = vmatprep.mubr.bf16.mxu0 %v115_v10  ;;  %v414_v15 = vunpack.c.h.bf16 %v125_v13  ;;  %v413_v16 = vunpack.c.l.bf16 %v125_v13  ;;  %v127_v20 = vld [vmem:[#allocation5 + $0x30] sm:$0xff]  }
  0x36   :  { %106 = vst.msk [vmem:[#allocation3 + $0x40] sm:$0xff] %vm97_vm0, %v1618_v0  ;;  %107 = vst.msk [vmem:[#allocation3 + $0x48] sm:$0xff] %vm97_vm0, %v1618_v0  ;;  %1349 = vmatprep.subr.bf16.mxu0 %v1416_v9  ;;  %v1419_v21 = vld [vmem:[#allocation8 + $0x18] sm:$0xff]   ;;  %v416_v22 = vunpack.c.h.bf16 %v127_v20  ;;  %v415_v23 = vunpack.c.l.bf16 %v127_v20  ;;  %v117_v24 = vld [vmem:[#allocation5 + $0x8] sm:$0xff]   ;;  %1406 = vset.pattern.permute.xlu0 %v1619_v33 }
  0x37   :  { %108 = vst.msk [vmem:[#allocation3 + $0x50] sm:$0xff] %vm97_vm0, %v1618_v0  ;;  %109 = vst.msk [vmem:[#allocation3 + $0x58] sm:$0xff] %vm97_vm0, %v1618_v0  ;;  %v1420_v25 = vld [vmem:[#allocation8 + $0x10] sm:$0xff]   ;;  %v406_v26 = vunpack.c.h.bf16 %v117_v24  ;;  %v405_v27 = vunpack.c.l.bf16 %v117_v24  ;;  %v129_v28 = vld [vmem:[#allocation5 + $0x38] sm:$0xff]   ;;  %1407 = vset.pattern.permute.xlu1 %v1619_v33 }
  0x38   :  { %110 = vst.msk [vmem:[#allocation3 + $0x60] sm:$0xff] %vm97_vm0, %v1618_v0  ;;  %111 = vst.msk [vmem:[#allocation3 + $0x68] sm:$0xff] %vm97_vm0, %v1618_v0  ;;  %433 = vadd.xlane.f32.xlu1 %v410_v6  ;;  %429 = vadd.xlane.f32.xlu0 %v408_v7  ;;  %v1421_v29 = vld [vmem:[#allocation8 + $0x8] sm:$0xff]   ;;  %v418_v30 = vunpack.c.h.bf16 %v129_v28  ;;  %v417_v31 = vunpack.c.l.bf16 %v129_v28  ;;  %v1422_v32 = vld [vmem:[#allocation8] sm:$0xff]  }
  0x39   :  { %112 = vst.msk [vmem:[#allocation3 + $0x70] sm:$0xff] %vm97_vm0, %v1618_v0  ;;  %113 = vst.msk [vmem:[#allocation3 + $0x78] sm:$0xff] %vm97_vm0, %v1618_v0  ;;  %1350 = vmatpush3.bf16.msra.mxu0 %v1416_v9  ;;  %v1424_v34 = vld [vmem:[#allocation11 + $0x78] sm:$0xff]   ;;  %v1426_v36 = vld [vmem:[#allocation11 + $0x70] sm:$0xff]  }
  0x3a   :  { %1351 = vmatprep.subr.bf16.mxu0 %v1417_v14  ;;  %v1425_v35 = vld [vmem:[#allocation11 + $0x38] sm:$0xff]   ;;  %1379 = vmatprep.subr.bf16.mxu1 %v1424_v34  ;;  %v1427_v37 = vld [vmem:[#allocation11 + $0x30] sm:$0xff]   ;;  %v1428_v38 = vld [vmem:[#allocation11 + $0x68] sm:$0xff]  }
  0x3b   :  { %1387 = vmatpush3.bf16.msra.mxu1 %v1425_v35  ;;  %v1429_v39 = vld [vmem:[#allocation11 + $0x28] sm:$0xff]   ;;  %v1430_v40 = vld [vmem:[#allocation11 + $0x60] sm:$0xff]   ;;  %v393_v41 = vld [vmem:[#allocation3 + $0x30] sm:$0xff] }
  0x3c   :  { %437 = vadd.xlane.f32.xlu1 %v412_v11  ;;  %435 = vadd.xlane.f32.xlu0 %v411_v12  ;;  %v391_v42 = vld [vmem:[#allocation3 + $0x20] sm:$0xff]  ;;  %v394_v47 = vld [vmem:[#allocation3 + $0x38] sm:$0xff]  ;;  %v392_v48 = vld [vmem:[#allocation3 + $0x28] sm:$0xff] }
  0x3d   :  { %1352 = vmatpush3.bf16.msra.mxu0 %v1417_v14  ;;  %1380 = vmatprep.subr.bf16.mxu1 %v1426_v36  ;;  %v396_v53 = vld [vmem:[#allocation3 + $0x48] sm:$0xff]  ;;  %v395_v54 = vld [vmem:[#allocation3 + $0x40] sm:$0xff] }
  0x3e   :  { %1353 = vmatprep.subr.bf16.mxu0 %v1418_v17  ;;  %v398_v59 = vld [vmem:[#allocation3 + $0x58] sm:$0xff]  ;;  %v397_v60 = vld [vmem:[#allocation3 + $0x50] sm:$0xff]  ;;  %v388_v4 = vld [vmem:[#allocation3 + $0x8] sm:$0xff] }
  0x3f   :  { %1388 = vmatpush3.bf16.msra.mxu1 %v1427_v37  ;;  %v400_v14 = vld [vmem:[#allocation3 + $0x68] sm:$0xff] }
  0x40   :  { %441 = vadd.xlane.f32.xlu1 %v414_v15  ;;  %439 = vadd.xlane.f32.xlu0 %v413_v16  ;;  %v399_v15 = vld [vmem:[#allocation3 + $0x60] sm:$0xff] }
  0x41   :  { %1354 = vmatpush3.bf16.msra.mxu0 %v1418_v17  ;;  %1381 = vmatprep.subr.bf16.mxu1 %v1428_v38 }
  0x42   :  { %1355 = vmatprep.subr.bf16.mxu0 %v1419_v21 }
  0x43   :  { %1389 = vmatpush3.bf16.msra.mxu1 %v1429_v39 }
  0x44   :  { %421 = vadd.xlane.f32.xlu1 %v404_v18  ;;  %419 = vadd.xlane.f32.xlu0 %v403_v19 }
  0x45   :  { %1356 = vmatpush3.bf16.msra.mxu0 %v1419_v21  ;;  %1382 = vmatprep.subr.bf16.mxu1 %v1430_v40 }
  0x46   :  { %1357 = vmatprep.subr.bf16.mxu0 %v1420_v25 }
  0x48   :  { %445 = vadd.xlane.f32.xlu1 %v416_v22  ;;  %443 = vadd.xlane.f32.xlu0 %v415_v23  ;;  %v390_v22 = vld [vmem:[#allocation3 + $0x18] sm:$0xff]  ;;  %v389_v23 = vld [vmem:[#allocation3 + $0x10] sm:$0xff] }
  0x49   :  { %1358 = vmatpush3.bf16.msra.mxu0 %v1420_v25 }
  0x4a   :  { %1359 = vmatprep.subr.bf16.mxu0 %v1421_v29 }
  0x4c   :  { %425 = vadd.xlane.f32.xlu1 %v406_v26  ;;  %423 = vadd.xlane.f32.xlu0 %v405_v27 }
  0x4d   :  { %1360 = vmatpush3.bf16.msra.mxu0 %v1421_v29 }
  0x4e   :  { %1361 = vmatprep.subr.bf16.mxu0 %v1422_v32 }
  0x50   :  { %449 = vadd.xlane.f32.xlu1 %v418_v30  ;;  %447 = vadd.xlane.f32.xlu0 %v417_v31  ;;  %v402_v31 = vld [vmem:[#allocation3 + $0x78] sm:$0xff] }
  0x51   :  { %1362 = vmatpush3.bf16.msra.mxu0 %v1422_v32  ;;  %v1432_v32 = vld [vmem:[#allocation11 + $0x58] sm:$0xff]  }
  0x52   :  { %1283 = vmatprep.subr.bf16.mxu0 %v1424_v34  ;;  %v401_v34 = vld [vmem:[#allocation3 + $0x70] sm:$0xff] }
  0x54   :  { %1364 = vmatmul.mubr.bf16.vlgmr.msra.gmra.mxu0 %v117_v24  ;;  %v1431_v24 = vld [vmem:[#allocation11 + $0x20] sm:$0xff]  }
  0x55   :  { %1367 = vmatprep.mubr.bf16.mxu0 %v1695_v2  ;;  %1284 = vmatpush3.bf16.msra.mxu0 %v1425_v35 }
  0x56   :  { %1285 = vmatprep.subr.bf16.mxu0 %v1426_v36  ;;  %1390 = vmatpush3.bf16.msra.mxu1 %v1431_v24  ;;  %v1433_v36 = vld [vmem:[#allocation11 + $0x18] sm:$0xff]  }
  0x57   :  { %1383 = vmatprep.subr.bf16.mxu1 %v1432_v32 }
  0x59   :  { %1286 = vmatpush3.bf16.msra.mxu0 %v1427_v37 }
  0x5a   :  { %1287 = vmatprep.subr.bf16.mxu0 %v1428_v38  ;;  %1391 = vmatpush3.bf16.msra.mxu1 %v1433_v36 }
  0x5c   :  { %1368 = vmatmul.mubr.bf16.gmra.mxu0 %v1693_v1 }
  0x5d   :  { %1371 = vmatprep.mubr.bf16.mxu0 %v1699_v5  ;;  %1288 = vmatpush3.bf16.msra.mxu0 %v1429_v39  ;;  %v387_v5 = vld [vmem:[#allocation3] sm:$0xff] }
  0x5e   :  { %1289 = vmatprep.subr.bf16.mxu0 %v1430_v40 }
  0x61   :  { %1290 = vmatpush3.bf16.msra.mxu0 %v1431_v24  ;;  %v704_v24 = vld [vmem:[#allocation10 + $0x24] sm:$0xf] }
  0x62   :  { %1291 = vmatprep.subr.bf16.mxu0 %v1432_v32  ;;  %720 = vst [vmem:[#allocation4 + $0x48] sm:$0xf] %v704_v24  ;;  %v698_v32 = vld [vmem:[#allocation10 + $0xc] sm:$0xf] }
  0x63   :  { %714 = vst [vmem:[#allocation4 + $0x18] sm:$0xf] %v698_v32 }
  0x64   :  { %1372 = vmatmul.mubr.bf16.gmra.mxu0 %v125_v13 }
  0x65   :  { %1375 = vmatprep.mubr.bf16.mxu0 %v127_v20  ;;  %1292 = vmatpush3.bf16.msra.mxu0 %v1433_v36 }
  0x6c   :  { %1376 = vmatmul.mubr.bf16.gmra.mxu0 %v129_v28 }
  0xbd   :  { %v432_v43 = vpop.xlane.xlu1 %431  ;;  %v428_v44 = vpop.xlane.xlu0 %427 }
  0xbe   :  { %v457_v45 = vadd.f32 %v432_v43, %v393_v41  ;;  %v455_v46 = vadd.f32 %v428_v44, %v391_v42  ;;  %v699_v43 = vld [vmem:[#allocation10 + $0x10] sm:$0xf] }
  0xbf   :  { %715 = vst [vmem:[#allocation4 + $0x20] sm:$0xf] %v699_v43 }
  0xc0   :  { %474 = vst.msk [vmem:[#allocation3 + $0x30] sm:$0xff] %vm97_vm0, %v457_v45  ;;  %472 = vst.msk [vmem:[#allocation3 + $0x20] sm:$0xff] %vm97_vm0, %v455_v46  ;;  %v1434_v46 = vld [vmem:[#allocation11 + $0x50] sm:$0xff]  }
  0xc1   :  { %v434_v49 = vpop.xlane.xlu1 %433  ;;  %v430_v50 = vpop.xlane.xlu0 %429  ;;  %1384 = vmatprep.subr.bf16.mxu1 %v1434_v46  ;;  %1293 = vmatprep.subr.bf16.mxu0 %v1434_v46 }
  0xc2   :  { %v458_v51 = vadd.f32 %v434_v49, %v394_v47  ;;  %v456_v52 = vadd.f32 %v430_v50, %v392_v48  ;;  %v1435_v49 = vld [vmem:[#allocation11 + $0x10] sm:$0xff]  }
  0xc3   :  { %1392 = vmatpush3.bf16.msra.mxu1 %v1435_v49  ;;  %1294 = vmatpush3.bf16.msra.mxu0 %v1435_v49  ;;  %v709_v49 = vld [vmem:[#allocation10 + $0x38] sm:$0xf] }
  0xc4   :  { %475 = vst.msk [vmem:[#allocation3 + $0x38] sm:$0xff] %vm97_vm0, %v458_v51  ;;  %473 = vst.msk [vmem:[#allocation3 + $0x28] sm:$0xff] %vm97_vm0, %v456_v52 }
  0xc5   :  { %v438_v55 = vpop.xlane.xlu1 %437  ;;  %v436_v56 = vpop.xlane.xlu0 %435  ;;  %725 = vst [vmem:[#allocation4 + $0x70] sm:$0xf] %v709_v49 }
  0xc6   :  { %v460_v57 = vadd.f32 %v438_v55, %v396_v53  ;;  %v459_v58 = vadd.f32 %v436_v56, %v395_v54  ;;  %v700_v55 = vld [vmem:[#allocation10 + $0x14] sm:$0xf]  ;;  %v1436_v56 = vld [vmem:[#allocation11 + $0x48] sm:$0xff]  }
  0xc7   :  { %v491_v61 = vld [vmem:[#allocation3 + $0x20] sm:$0xff]  ;;  %v1714_v1 = vld [vmem:[#allocation3 + $0x30] sm:$0xff]  ;;  %716 = vst [vmem:[#allocation4 + $0x28] sm:$0xf] %v700_v55  ;;  %1385 = vmatprep.subr.bf16.mxu1 %v1436_v56  ;;  %1295 = vmatprep.subr.bf16.mxu0 %v1436_v56 }
  0xc8   :  { %477 = vst.msk [vmem:[#allocation3 + $0x48] sm:$0xff] %vm97_vm0, %v460_v57  ;;  %476 = vst.msk [vmem:[#allocation3 + $0x40] sm:$0xff] %vm97_vm0, %v459_v58  ;;  %v523_v62 = vmax.f32 %v491_v61, 1.0  ;;  %v525_v8 = vmax.f32 %v1714_v1, 1.0  ;;  %vm507_vm1 = vcmp.gt.f32.partialorder %v491_v61, 0.0  ;;  %vm509_vm3 = vcmp.gt.f32.partialorder %v1714_v1, 0.0 }
  0xc9   :  { %v442_v63 = vpop.xlane.xlu1 %441  ;;  %v440_v0 = vpop.xlane.xlu0 %439  ;;  %v1437_v58 = vld [vmem:[#allocation11 + $0x8] sm:$0xff]  }
  0xca   :  { %v462_v2 = vadd.f32 %v442_v63, %v398_v59  ;;  %v461_v3 = vadd.f32 %v440_v0, %v397_v60  ;;  %1472 = vrcp.f32 %v523_v62  ;;  %1393 = vmatpush3.bf16.msra.mxu1 %v1437_v58  ;;  %v701_v0 = vld [vmem:[#allocation10 + $0x18] sm:$0xf]  ;;  %1296 = vmatpush3.bf16.msra.mxu0 %v1437_v58 }
  0xcb   :  { %v1716_v6 = vld [vmem:[#allocation3 + $0x28] sm:$0xff]  ;;  %v1722_v11 = vld [vmem:[#allocation3 + $0x38] sm:$0xff]  ;;  %717 = vst [vmem:[#allocation4 + $0x30] sm:$0xf] %v701_v0 }
  0xcc   :  { %479 = vst.msk [vmem:[#allocation3 + $0x58] sm:$0xff] %vm97_vm0, %v462_v2  ;;  %478 = vst.msk [vmem:[#allocation3 + $0x50] sm:$0xff] %vm97_vm0, %v461_v3  ;;  %v524_v7 = vmax.f32 %v1716_v6, 1.0  ;;  %v526_v16 = vmax.f32 %v1722_v11, 1.0  ;;  %vm508_vm2 = vcmp.gt.f32.partialorder %v1716_v6, 0.0  ;;  %v1438_v2 = vld [vmem:[#allocation11 + $0x40] sm:$0xff]  }
  0xcd   :  { %v422_v9 = vpop.xlane.xlu1 %421  ;;  %v420_v10 = vpop.xlane.xlu0 %419  ;;  %vm510_vm4 = vcmp.gt.f32.partialorder %v1722_v11, 0.0  ;;  %v1439_v3 = vld [vmem:[#allocation11] sm:$0xff]   ;;  %1386 = vmatprep.subr.bf16.mxu1 %v1438_v2  ;;  %1297 = vmatprep.subr.bf16.mxu0 %v1438_v2 }
  0xce   :  { %v452_v12 = vadd.f32 %v422_v9, %v388_v4  ;;  %v451_v13 = vadd.f32 %v420_v10, %v387_v5  ;;  %1474 = vrcp.f32 %v524_v7  ;;  %1394 = vmatpush3.bf16.msra.mxu1 %v1439_v3  ;;  %v702_v9 = vld [vmem:[#allocation10 + $0x1c] sm:$0xf]  ;;  %1298 = vmatpush3.bf16.msra.mxu0 %v1439_v3 }
  0xcf   :  { %1476 = vrcp.f32 %v525_v8  ;;  %v1727_v19 = vld [vmem:[#allocation3 + $0x40] sm:$0xff]  ;;  %v1732_v28 = vld [vmem:[#allocation3 + $0x48] sm:$0xff]  ;;  %718 = vst [vmem:[#allocation4 + $0x38] sm:$0xf] %v702_v9 }
  0xd0   :  { %469 = vst.msk [vmem:[#allocation3 + $0x8] sm:$0xff] %vm97_vm0, %v452_v12  ;;  %468 = vst.msk [vmem:[#allocation3] sm:$0xff] %vm97_vm0, %v451_v13  ;;  %1478 = vrcp.f32 %v526_v16  ;;  %v527_v25 = vmax.f32 %v1727_v19, 1.0  ;;  %v528_v39 = vmax.f32 %v1732_v28, 1.0  ;;  %vm511_vm6 = vcmp.gt.f32.partialorder %v1727_v19, 0.0 }
  0xd1   :  { %v446_v17 = vpop.xlane.xlu1 %445  ;;  %v444_v18 = vpop.xlane.xlu0 %443  ;;  %v703_v16 = vld [vmem:[#allocation10 + $0x20] sm:$0xf]  ;;  %vm512_vm8 = vcmp.gt.f32.partialorder %v1732_v28, 0.0 }
  0xd2   :  { %v464_v20 = vadd.f32 %v446_v17, %v400_v14  ;;  %v463_v21 = vadd.f32 %v444_v18, %v399_v15  ;;  %1480 = vrcp.f32 %v527_v25  ;;  %v696_v17 = vld [vmem:[#allocation10 + $0x4] sm:$0xf]  ;;  %719 = vst [vmem:[#allocation4 + $0x40] sm:$0xf] %v703_v16  ;;  %v708_v25 = vld [vmem:[#allocation10 + $0x34] sm:$0xf] }
  0xd3   :  { %v1740_v42 = vld [vmem:[#allocation3 + $0x50] sm:$0xff]  ;;  %v1749_v54 = vld [vmem:[#allocation3 + $0x58] sm:$0xff]  ;;  %712 = vst [vmem:[#allocation4 + $0x8] sm:$0xf] %v696_v17  ;;  %724 = vst [vmem:[#allocation4 + $0x68] sm:$0xf] %v708_v25 }
  0xd4   :  { %481 = vst.msk [vmem:[#allocation3 + $0x68] sm:$0xff] %vm97_vm0, %v464_v20  ;;  %480 = vst.msk [vmem:[#allocation3 + $0x60] sm:$0xff] %vm97_vm0, %v463_v21  ;;  %v529_v52 = vmax.f32 %v1740_v42, 1.0  ;;  %v530_v61 = vmax.f32 %v1749_v54, 1.0  ;;  %vm513_vm10 = vcmp.gt.f32.partialorder %v1740_v42, 0.0  ;;  %vm514_vm11 = vcmp.gt.f32.partialorder %v1749_v54, 0.0 }
  0xd5   :  { %v426_v26 = vpop.xlane.xlu1 %425  ;;  %v424_v27 = vpop.xlane.xlu0 %423 }
  0xd6   :  { %v454_v29 = vadd.f32 %v426_v26, %v390_v22  ;;  %v453_v30 = vadd.f32 %v424_v27, %v389_v23 }
  0xd7   :  { %v1473_v33 = vpop.eup %1472  ;;  %v1734_v35 = vld [vmem:[#allocation3 + $0x8] sm:$0xff]  ;;  %v1756_v63 = vld [vmem:[#allocation3] sm:$0xff] }
  0xd8   :  { %471 = vst.msk [vmem:[#allocation3 + $0x18] sm:$0xff] %vm97_vm0, %v454_v29  ;;  %470 = vst.msk [vmem:[#allocation3 + $0x10] sm:$0xff] %vm97_vm0, %v453_v30  ;;  %v571_v37 = vsel %vm507_vm1, %v1473_v33, 0.0  ;;  %v520_v38 = vmax.f32 %v1734_v35, 1.0  ;;  %v519_v6 = vmax.f32 %v1756_v63, 1.0  ;;  %vm504_vm5 = vcmp.gt.f32.partialorder %v1734_v35, 0.0 }
  0xd9   :  { %v450_v40 = vpop.xlane.xlu1 %449  ;;  %621 = vperm.xlu0 %1406, %v571_v37   ;;  %v448_v41 = vpop.xlane.xlu0 %447  ;;  %vm503_vm13 = vcmp.gt.f32.partialorder %v1756_v63, 0.0  ;;  %v706_v37 = vld [vmem:[#allocation10 + $0x2c] sm:$0xf] }
  0xda   :  { %v466_v44 = vadd.f32 %v450_v40, %v402_v31  ;;  %v465_v45 = vadd.f32 %v448_v41, %v401_v34  ;;  %1482 = vrcp.f32 %v520_v38  ;;  %v705_v31 = vld [vmem:[#allocation10 + $0x28] sm:$0xf]  ;;  %v710_v38 = vld [vmem:[#allocation10 + $0x3c] sm:$0xf]  ;;  %722 = vst [vmem:[#allocation4 + $0x58] sm:$0xf] %v706_v37 }
  0xdb   :  { %v1475_v47 = vpop.eup %1474  ;;  %v1743_v48 = vld [vmem:[#allocation3 + $0x68] sm:$0xff]  ;;  %1484 = vrcp.f32 %v528_v39  ;;  %v1764_v8 = vld [vmem:[#allocation3 + $0x60] sm:$0xff]  ;;  %721 = vst [vmem:[#allocation4 + $0x50] sm:$0xf] %v705_v31  ;;  %726 = vst [vmem:[#allocation4 + $0x78] sm:$0xf] %v710_v38 }
  0xdc   :  { %483 = vst.msk [vmem:[#allocation3 + $0x78] sm:$0xff] %vm97_vm0, %v466_v44  ;;  %482 = vst.msk [vmem:[#allocation3 + $0x70] sm:$0xff] %vm97_vm0, %v465_v45  ;;  %v572_v50 = vsel %vm508_vm2, %v1475_v47, 0.0  ;;  %v532_v51 = vmax.f32 %v1743_v48, 1.0  ;;  %v1477_v53 = vpop.eup %1476  ;;  %v531_v13 = vmax.f32 %v1764_v8, 1.0  ;;  %vm516_vm7 = vcmp.gt.f32.partialorder %v1743_v48, 0.0 }
  0xdd   :  { %626 = vperm.xlu1 %1407, %v572_v50   ;;  %v573_v59 = vsel %vm509_vm3, %v1477_v53, 0.0  ;;  %v1479_v62 = vpop.eup %1478  ;;  %vm515_vm14 = vcmp.gt.f32.partialorder %v1764_v8, 0.0  ;;  %v695_v41 = vld [vmem:[#allocation10] sm:$0xf]  ;;  %v707_v44 = vld [vmem:[#allocation10 + $0x30] sm:$0xf] }
  0xde   :  { %1486 = vrcp.f32 %v532_v51  ;;  %v574_v4 = vsel %vm510_vm4, %v1479_v62, 0.0  ;;  %711 = vst [vmem:[#allocation4] sm:$0xf] %v695_v41  ;;  %723 = vst [vmem:[#allocation4 + $0x60] sm:$0xf] %v707_v44 }
  0xdf   :  { %v1752_v57 = vld [vmem:[#allocation3 + $0x18] sm:$0xff]  ;;  %1488 = vrcp.f32 %v529_v52  ;;  %v1481_v7 = vpop.eup %1480  ;;  %v489_v15 = vld [vmem:[#allocation3 + $0x10] sm:$0xff]  ;;  %v697_v47 = vld [vmem:[#allocation10 + $0x8] sm:$0xf] }
  0xe0   :  { %v522_v60 = vmax.f32 %v1752_v57, 1.0  ;;  %v575_v11 = vsel %vm511_vm6, %v1481_v7, 0.0  ;;  %v521_v21 = vmax.f32 %v489_v15, 1.0  ;;  %vm506_vm9 = vcmp.gt.f32.partialorder %v1752_v57, 0.0  ;;  %713 = vst [vmem:[#allocation4 + $0x10] sm:$0xf] %v697_v47 }
  0xe1   :  { %631 = vperm.xlu1 %1407, %v573_v59   ;;  %vm505_vm15 = vcmp.gt.f32.partialorder %v489_v15, 0.0  ;;  %v1440_v15 = vld [vmem:[#allocation4 + $0x20] ss:$8 sps:$4 sm:$0xff]   ;;  %v1445_v31 = vld [vmem:[#allocation4 + $0x30] ss:$8 sps:$4 sm:$0xff]  }
  0xe2   :  { %1490 = vrcp.f32 %v522_v60  ;;  %v1448_v44 = vld [vmem:[#allocation4 + $0x40] ss:$8 sps:$4 sm:$0xff]  }
  0xe3   :  { %v1759_v1 = vld [vmem:[#allocation3 + $0x78] sm:$0xff]  ;;  %1492 = vrcp.f32 %v530_v61  ;;  %v501_v23 = vld [vmem:[#allocation3 + $0x70] sm:$0xff] }
  0xe4   :  { %v534_v5 = vmax.f32 %v1759_v1, 1.0  ;;  %v533_v28 = vmax.f32 %v501_v23, 1.0  ;;  %vm518_vm12 = vcmp.gt.f32.partialorder %v1759_v1, 0.0  ;;  %vm517_vm0 = vcmp.gt.f32.partialorder %v501_v23, 0.0 }
  0xe5   :  { %636 = vperm.xlu1 %1407, %v574_v4  }
  0xe6   :  { %1494 = vrcp.f32 %v534_v5 }
  0xe7   :  { %v1483_v10 = vpop.eup %1482  ;;  %1496 = vrcp.f32 %v519_v6 }
  0xe8   :  { %v568_v12 = vsel %vm504_vm5, %v1483_v10, 0.0  ;;  %v1485_v14 = vpop.eup %1484  ;;  %1498 = vrcp.f32 %v531_v13 }
  0xe9   :  { %641 = vperm.xlu1 %1407, %v575_v11   ;;  %606 = vperm.xlu0 %1406, %v568_v12   ;;  %v576_v20 = vsel %vm512_vm8, %v1485_v14, 0.0  ;;  %1500 = vrcp.f32 %v521_v21 }
  0xea   :  { %1502 = vrcp.f32 %v533_v28 }
  0xeb   :  { %v1487_v18 = vpop.eup %1486 }
  0xec   :  { %v580_v19 = vsel %vm516_vm7, %v1487_v18, 0.0  ;;  %v1489_v22 = vpop.eup %1488 }
  0xed   :  { %646 = vperm.xlu1 %1407, %v576_v20   ;;  %666 = vperm.xlu0 %1406, %v580_v19   ;;  %v577_v27 = vsel %vm513_vm10, %v1489_v22, 0.0 }
  0xef   :  { %v1491_v26 = vpop.eup %1490 }
  0xf0   :  { %v570_v29 = vsel %vm506_vm9, %v1491_v26, 0.0  ;;  %v1493_v30 = vpop.eup %1492 }
  0xf1   :  { %651 = vperm.xlu1 %1407, %v577_v27   ;;  %616 = vperm.xlu0 %1406, %v570_v29   ;;  %v578_v34 = vsel %vm514_vm11, %v1493_v30, 0.0 }
  0xf3   :  { %v1495_v33 = vpop.eup %1494 }
  0xf4   :  { %v582_v35 = vsel %vm518_vm12, %v1495_v33, 0.0  ;;  %v1497_v36 = vpop.eup %1496 }
  0xf5   :  { %656 = vperm.xlu1 %1407, %v578_v34   ;;  %676 = vperm.xlu0 %1406, %v582_v35   ;;  %v567_v39 = vsel %vm503_vm13, %v1497_v36, 0.0  ;;  %v1499_v40 = vpop.eup %1498 }
  0xf6   :  { %v579_v42 = vsel %vm515_vm14, %v1499_v40, 0.0  ;;  %v1501_v43 = vpop.eup %1500 }
  0xf7   :  { %v569_v45 = vsel %vm505_vm15, %v1501_v43, 0.0  ;;  %v1503_v46 = vpop.eup %1502 }
  0xf8   :  { %v581_v48 = vsel %vm517_vm0, %v1503_v46, 0.0 }
  0xf9   :  { %601 = vperm.xlu1 %1407, %v567_v39  }
  0xfd   :  { %661 = vperm.xlu1 %1407, %v579_v42  }
 0x101   :  { %611 = vperm.xlu1 %1407, %v569_v45  }
 0x105   :  { %671 = vperm.xlu1 %1407, %v581_v48  }
 0x114   :  { %v1776_v50 = vpop.f32.mrf.mxu0 }
 0x116   :  { %v1778_v51 = vpop.f32.mrf.mxu0 }
 0x118   :  { %v1366_v52 = vpop.f32.mrf.mxu0 }
 0x11a   :  { %v295_v53 = vpop.f32.mrf.mxu0 }
 0x11c   :  { %v1369_v54 = vpop.f32.mrf.mxu0 }
 0x11e   :  { %v308_v55 = vpop.f32.mrf.mxu0 }
 0x120   :  { %v1370_v56 = vpop.f32.mrf.mxu0 }
 0x122   :  { %v311_v57 = vpop.f32.mrf.mxu0 }
 0x124   :  { %v1373_v58 = vpop.f32.mrf.mxu0 }
 0x126   :  { %v324_v59 = vpop.f32.mrf.mxu0 }
 0x128   :  { %v1374_v60 = vpop.f32.mrf.mxu0 }
 0x12a   :  { %v327_v63 = vpop.f32.mrf.mxu0 }
 0x12c   :  { %v1780_v3 = vpop.f32.mrf.mxu0 }
 0x12e   :  { %v340_v7 = vpop.f32.mrf.mxu0 }
 0x130   :  { %v1378_v11 = vpop.f32.mrf.mxu0 }
 0x132   :  { %v343_v20 = vpop.f32.mrf.mxu0 }
 0x154   :  { %v622_v61 = vpop.permute.xlu0 %621 }
 0x155   :  { %v683_v62 = vmul.f32 %v622_v61, %v308_v55 }
 0x157   :  { %v1255_v0 = vpack.c.bf16 %v683_v62, %v683_v62  ;;  %v1457_v62 = vld [vmem:[#allocation4 + $0x60] ss:$8 sps:$4 sm:$0xff]  }
 0x158   :  { %v627_v2 = vpop.permute.xlu1 %626 }
 0x159   :  { %795 = vst [vmem:[#allocation4 + $0x24] sm:$0xf] %v1255_v0  ;;  %v684_v1 = vmul.f32 %v627_v2, %v311_v57  ;;  %v1460_v0 = vld [vmem:[#allocation4 + $0x10] ss:$8 sps:$4 sm:$0xff]  }
 0x15a   :  { %v1463_v2 = vld [vmem:[#allocation4 + $0x70] ss:$8 sps:$4 sm:$0xff]  }
 0x15b   :  { %v1256_v4 = vpack.c.bf16 %v684_v1, %v684_v1 }
 0x15c   :  { %v632_v5 = vpop.permute.xlu1 %631 }
 0x15d   :  { %796 = vst [vmem:[#allocation4 + $0x2c] sm:$0xf] %v1256_v4  ;;  %v685_v6 = vmul.f32 %v1369_v54, %v632_v5  ;;  %v1451_v54 = vld [vmem:[#allocation4 + $0x50] ss:$8 sps:$4 sm:$0xff]  }
 0x15f   :  { %v1257_v8 = vpack.c.bf16 %v685_v6, %v685_v6 }
 0x160   :  { %v637_v9 = vpop.permute.xlu1 %636 }
 0x161   :  { %797 = vst [vmem:[#allocation4 + $0x34] sm:$0xf] %v1257_v8  ;;  %v686_v10 = vmul.f32 %v1370_v56, %v637_v9 }
 0x163   :  { %v1258_v12 = vpack.c.bf16 %v686_v10, %v686_v10 }
 0x164   :  { %v642_v13 = vpop.permute.xlu1 %641  ;;  %v607_v14 = vpop.permute.xlu0 %606  ;;  %v1442_v16 = vld [vmem:[#allocation4 + $0x24] ss:$8 sps:$4 sm:$0xff]  }
 0x165   :  { %798 = vst [vmem:[#allocation4 + $0x3c] sm:$0xf] %v1258_v12  ;;  %v687_v17 = vmul.f32 %v642_v13, %v324_v59  ;;  %v680_v18 = vmul.f32 %v607_v14, %v295_v53  ;;  %1086 = vmatprep.mubr.bf16.mxu1 %v1442_v16 }
 0x166   :  { %1087 = vmatmul.mubr.bf16.vlgmr.msra.gmra.mxu1 %v1440_v15 }
 0x167   :  { %v1259_v19 = vpack.c.bf16 %v687_v17, %v687_v17  ;;  %v1252_v21 = vpack.c.bf16 %v680_v18, %v680_v18 }
 0x168   :  { %v647_v22 = vpop.permute.xlu1 %646  ;;  %v667_v23 = vpop.permute.xlu0 %666 }
 0x169   :  { %799 = vst [vmem:[#allocation4 + $0x44] sm:$0xf] %v1259_v19  ;;  %792 = vst [vmem:[#allocation4 + $0xc] sm:$0xf] %v1252_v21  ;;  %v688_v24 = vmul.f32 %v647_v22, %v327_v63  ;;  %v692_v25 = vmul.f32 %v667_v23, %v343_v20 }
 0x16b   :  { %v1260_v26 = vpack.c.bf16 %v688_v24, %v688_v24  ;;  %v1264_v27 = vpack.c.bf16 %v692_v25, %v692_v25 }
 0x16c   :  { %v652_v29 = vpop.permute.xlu1 %651  ;;  %v617_v28 = vpop.permute.xlu0 %616  ;;  %v1443_v30 = vld [vmem:[#allocation4 + $0x34] ss:$8 sps:$4 sm:$0xff]  }
 0x16d   :  { %800 = vst [vmem:[#allocation4 + $0x4c] sm:$0xf] %v1260_v26  ;;  %804 = vst [vmem:[#allocation4 + $0x6c] sm:$0xf] %v1264_v27  ;;  %v689_v32 = vmul.f32 %v1373_v58, %v652_v29  ;;  %v682_v33 = vmul.f32 %v1366_v52, %v617_v28  ;;  %1094 = vmatprep.mubr.bf16.mxu1 %v1443_v30  ;;  %v1452_v58 = vld [vmem:[#allocation4] ss:$8 sps:$4 sm:$0xff]  }
 0x16e   :  { %1095 = vmatmul.mubr.bf16.gmra.mxu1 %v1445_v31 }
 0x16f   :  { %v1261_v34 = vpack.c.bf16 %v689_v32, %v689_v32  ;;  %v1254_v35 = vpack.c.bf16 %v682_v33, %v682_v33 }
 0x170   :  { %v657_v36 = vpop.permute.xlu1 %656  ;;  %v677_v37 = vpop.permute.xlu0 %676 }
 0x171   :  { %801 = vst [vmem:[#allocation4 + $0x54] sm:$0xf] %v1261_v34  ;;  %794 = vst [vmem:[#allocation4 + $0x1c] sm:$0xf] %v1254_v35  ;;  %v690_v38 = vmul.f32 %v1374_v60, %v657_v36  ;;  %v694_v39 = vmul.f32 %v1378_v11, %v677_v37 }
 0x173   :  { %v1262_v40 = vpack.c.bf16 %v690_v38, %v690_v38  ;;  %v1266_v41 = vpack.c.bf16 %v694_v39, %v694_v39 }
 0x174   :  { %v602_v42 = vpop.permute.xlu1 %601  ;;  %v1446_v43 = vld [vmem:[#allocation4 + $0x44] ss:$8 sps:$4 sm:$0xff]  }
 0x175   :  { %802 = vst [vmem:[#allocation4 + $0x5c] sm:$0xf] %v1262_v40  ;;  %806 = vst [vmem:[#allocation4 + $0x7c] sm:$0xf] %v1266_v41  ;;  %v679_v45 = vmul.f32 %v602_v42, %v1778_v51  ;;  %1102 = vmatprep.mubr.bf16.mxu1 %v1446_v43 }
 0x176   :  { %1103 = vmatmul.mubr.bf16.gmra.mxu1 %v1448_v44 }
 0x177   :  { %v1251_v46 = vpack.c.bf16 %v679_v45, %v679_v45 }
 0x178   :  { %v662_v47 = vpop.permute.xlu1 %661 }
 0x179   :  { %791 = vst [vmem:[#allocation4 + $0x4] sm:$0xf] %v1251_v46  ;;  %v691_v48 = vmul.f32 %v662_v47, %v340_v7 }
 0x17b   :  { %v1263_v49 = vpack.c.bf16 %v691_v48, %v691_v48 }
 0x17c   :  { %v612_v52 = vpop.permute.xlu1 %611  ;;  %v1449_v53 = vld [vmem:[#allocation4 + $0x54] ss:$8 sps:$4 sm:$0xff]  }
 0x17d   :  { %803 = vst [vmem:[#allocation4 + $0x64] sm:$0xf] %v1263_v49  ;;  %v681_v55 = vmul.f32 %v1776_v50, %v612_v52  ;;  %1110 = vmatprep.mubr.bf16.mxu1 %v1449_v53 }
 0x17e   :  { %1111 = vmatmul.mubr.bf16.gmra.mxu1 %v1451_v54 }
 0x17f   :  { %v1253_v56 = vpack.c.bf16 %v681_v55, %v681_v55 }
 0x180   :  { %v672_v57 = vpop.permute.xlu1 %671  ;;  %v1454_v59 = vld [vmem:[#allocation4 + $0x4] ss:$8 sps:$4 sm:$0xff]  }
 0x181   :  { %793 = vst [vmem:[#allocation4 + $0x14] sm:$0xf] %v1253_v56  ;;  %v693_v51 = vmul.f32 %v1780_v3, %v672_v57  ;;  %1070 = vmatprep.mubr.bf16.mxu0 %v1454_v59  ;;  %v1788_v3 = vld [vmem:[%s1813_s4] ss:$0 sm:$0xff]  ;;  %s1620_s4 = smov [#allocation13]  }
 0x182   :  { %1071 = vmatmul.mubr.bf16.vlgmr.msra.gmra.mxu0 %v1452_v58  ;;  %s1172_s13 = sshll.u32 %s1620_s4, 4  ;;  %s1173_s13 = int_to_ptr.vmem [resolvable:$true] %s1172_s13 }
 0x183   :  { %v1265_v60 = vpack.c.bf16 %v693_v51, %v693_v51  ;;  %s1584_s14 = scalar_lea.vmem %s1173_s13, 2048  ;;  %p1589_p7 = scmp.lt.s32.totalorder %s1173_s13, %s1173_s13 }
 0x184   :  { %v1455_v61 = vld [vmem:[#allocation4 + $0x64] ss:$8 sps:$4 sm:$0xff]   ;;  %p1585_p6 = scmp.ne.s32.totalorder %s1173_s13, %s1584_s14  ;;  %p1590_p8 = scmp.lt.s32.totalorder %s1584_s14, %s1584_s14 }
 0x185   :  { %805 = vst [vmem:[#allocation4 + $0x74] sm:$0xf] %v1265_v60  ;;  %1118 = vmatprep.mubr.bf16.mxu1 %v1455_v61 }
 0x186   :  { %1119 = vmatmul.mubr.bf16.gmra.mxu1 %v1457_v62  ;;  %p1591_p9 = por %p1590_p8, %p1589_p7 }
 0x188   :  { %v1458_v63 = vld [vmem:[#allocation4 + $0x14] ss:$8 sps:$4 sm:$0xff]   ;;  %p1592_p10 = pnand %p1591_p9, %p1585_p6 }
 0x189   :  { %1078 = vmatprep.mubr.bf16.mxu0 %v1458_v63 }
 0x18a   :  { %1079 = vmatmul.mubr.bf16.gmra.mxu0 %v1460_v0 }
 0x18c   :  { %v1461_v50 = vld [vmem:[#allocation4 + $0x74] ss:$8 sps:$4 sm:$0xff]  }
 0x18d   :  { %1126 = vmatprep.mubr.bf16.mxu1 %v1461_v50 }
 0x18e   :  { %1127 = vmatmul.mubr.bf16.gmra.mxu1 %v1463_v2 }
 0x226   :  { %v1311_v1 = vpop.f32.mrf.mxu1 }
 0x228   :  { %v1312_v4 = vpop.f32.mrf.mxu1 }
 0x229   :  { %v1313_v5 = vadd.f32 %v1312_v4, %v1311_v1 }
 0x22a   :  { %v1314_v6 = vpop.f32.mrf.mxu1 }
 0x22b   :  { %v1089_v7 = vadd.f32 %v1313_v5, %v1788_v3 }
 0x22c   :  { %v1315_v8 = vpop.f32.mrf.mxu1 }
 0x22d   :  { %v1139_v9 = vmax.f32 %v1089_v7, 0.0  ;;  %v1316_v10 = vadd.f32 %v1315_v8, %v1314_v6 }
 0x22e   :  { %v1317_v11 = vpop.f32.mrf.mxu1 }
 0x22f   :  { %1155 = vst [vmem:[#allocation13 + $0x20] sm:$0xff] %v1139_v9  ;;  %v1092_v12 = vadd.f32 %v1316_v10, %v1788_v3 }
 0x230   :  { %v1318_v13 = vpop.f32.mrf.mxu1 }
 0x231   :  { %v1140_v14 = vmax.f32 %v1092_v12, 0.0  ;;  %v1319_v15 = vadd.f32 %v1318_v13, %v1317_v11 }
 0x232   :  { %v1320_v16 = vpop.f32.mrf.mxu1 }
 0x233   :  { %1156 = vst [vmem:[#allocation13 + $0x28] sm:$0xff] %v1140_v14  ;;  %v1097_v17 = vadd.f32 %v1319_v15, %v1788_v3 }
 0x234   :  { %v1321_v18 = vpop.f32.mrf.mxu1 }
 0x235   :  { %v1141_v20 = vmax.f32 %v1097_v17, 0.0  ;;  %v1322_v19 = vadd.f32 %v1321_v18, %v1320_v16 }
 0x236   :  { %v1323_v21 = vpop.f32.mrf.mxu1 }
 0x237   :  { %1157 = vst [vmem:[#allocation13 + $0x30] sm:$0xff] %v1141_v20  ;;  %v1100_v22 = vadd.f32 %v1322_v19, %v1788_v3 }
 0x238   :  { %v1324_v23 = vpop.f32.mrf.mxu1 }
 0x239   :  { %v1142_v24 = vmax.f32 %v1100_v22, 0.0  ;;  %v1325_v25 = vadd.f32 %v1324_v23, %v1323_v21 }
 0x23a   :  { %v1326_v26 = vpop.f32.mrf.mxu1 }
 0x23b   :  { %1158 = vst [vmem:[#allocation13 + $0x38] sm:$0xff] %v1142_v24  ;;  %v1105_v27 = vadd.f32 %v1325_v25, %v1788_v3 }
 0x23c   :  { %v1327_v29 = vpop.f32.mrf.mxu1 }
 0x23d   :  { %v1143_v28 = vmax.f32 %v1105_v27, 0.0  ;;  %v1328_v30 = vadd.f32 %v1327_v29, %v1326_v26 }
 0x23e   :  { %v1329_v31 = vpop.f32.mrf.mxu1 }
 0x23f   :  { %1159 = vst [vmem:[#allocation13 + $0x40] sm:$0xff] %v1143_v28  ;;  %v1108_v32 = vadd.f32 %v1328_v30, %v1788_v3 }
 0x240   :  { %v1330_v33 = vpop.f32.mrf.mxu1 }
 0x241   :  { %v1144_v34 = vmax.f32 %v1108_v32, 0.0  ;;  %v1331_v35 = vadd.f32 %v1330_v33, %v1329_v31 }
 0x242   :  { %v1299_v36 = vpop.f32.mrf.mxu0  ;;  %v1332_v37 = vpop.f32.mrf.mxu1 }
 0x243   :  { %1160 = vst [vmem:[#allocation13 + $0x48] sm:$0xff] %v1144_v34  ;;  %v1113_v38 = vadd.f32 %v1331_v35, %v1788_v3 }
 0x244   :  { %v1300_v39 = vpop.f32.mrf.mxu0  ;;  %v1333_v40 = vpop.f32.mrf.mxu1 }
 0x245   :  { %v1145_v41 = vmax.f32 %v1113_v38, 0.0  ;;  %v1301_v42 = vadd.f32 %v1300_v39, %v1299_v36  ;;  %v1334_v43 = vadd.f32 %v1333_v40, %v1332_v37 }
 0x246   :  { %v1302_v44 = vpop.f32.mrf.mxu0  ;;  %v1335_v45 = vpop.f32.mrf.mxu1 }
 0x247   :  { %1161 = vst [vmem:[#allocation13 + $0x50] sm:$0xff] %v1145_v41  ;;  %v1073_v46 = vadd.f32 %v1301_v42, %v1788_v3  ;;  %v1116_v47 = vadd.f32 %v1334_v43, %v1788_v3 }
 0x248   :  { %v1303_v48 = vpop.f32.mrf.mxu0  ;;  %v1336_v49 = vpop.f32.mrf.mxu1 }
 0x249   :  { %v1135_v52 = vmax.f32 %v1073_v46, 0.0  ;;  %v1146_v53 = vmax.f32 %v1116_v47, 0.0  ;;  %v1304_v54 = vadd.f32 %v1303_v48, %v1302_v44  ;;  %v1337_v55 = vadd.f32 %v1336_v49, %v1335_v45 }
 0x24a   :  { %v1305_v56 = vpop.f32.mrf.mxu0  ;;  %v1338_v57 = vpop.f32.mrf.mxu1 }
 0x24b   :  { %1151 = vst [vmem:[#allocation13] sm:$0xff] %v1135_v52  ;;  %1162 = vst [vmem:[#allocation13 + $0x58] sm:$0xff] %v1146_v53  ;;  %v1076_v58 = vadd.f32 %v1304_v54, %v1788_v3  ;;  %v1121_v59 = vadd.f32 %v1337_v55, %v1788_v3 }
 0x24c   :  { %v1306_v51 = vpop.f32.mrf.mxu0  ;;  %v1339_v60 = vpop.f32.mrf.mxu1 }
 0x24d   :  { %v1136_v61 = vmax.f32 %v1076_v58, 0.0  ;;  %v1147_v62 = vmax.f32 %v1121_v59, 0.0  ;;  %v1307_v63 = vadd.f32 %v1306_v51, %v1305_v56  ;;  %v1340_v0 = vadd.f32 %v1339_v60, %v1338_v57 }
 0x24e   :  { %v1308_v50 = vpop.f32.mrf.mxu0  ;;  %v1341_v2 = vpop.f32.mrf.mxu1 }
 0x24f   :  { %1152 = vst [vmem:[#allocation13 + $0x8] sm:$0xff] %v1136_v61  ;;  %1163 = vst [vmem:[#allocation13 + $0x60] sm:$0xff] %v1147_v62  ;;  %v1081_v1 = vadd.f32 %v1307_v63, %v1788_v3  ;;  %v1124_v4 = vadd.f32 %v1340_v0, %v1788_v3 }
 0x250   :  { %v1309_v5 = vpop.f32.mrf.mxu0  ;;  %v1342_v6 = vpop.f32.mrf.mxu1 }
 0x251   :  { %v1137_v7 = vmax.f32 %v1081_v1, 0.0  ;;  %v1148_v8 = vmax.f32 %v1124_v4, 0.0  ;;  %v1310_v9 = vadd.f32 %v1309_v5, %v1308_v50  ;;  %v1343_v10 = vadd.f32 %v1342_v6, %v1341_v2 }
 0x252   :  { %v1344_v11 = vpop.f32.mrf.mxu1 }
 0x253   :  { %1153 = vst [vmem:[#allocation13 + $0x10] sm:$0xff] %v1137_v7  ;;  %1164 = vst [vmem:[#allocation13 + $0x68] sm:$0xff] %v1148_v8  ;;  %v1084_v12 = vadd.f32 %v1310_v9, %v1788_v3  ;;  %v1129_v13 = vadd.f32 %v1343_v10, %v1788_v3 }
 0x254   :  { %v1345_v14 = vpop.f32.mrf.mxu1 }
 0x255   :  { %v1138_v15 = vmax.f32 %v1084_v12, 0.0  ;;  %v1149_v16 = vmax.f32 %v1129_v13, 0.0  ;;  %v1346_v17 = vadd.f32 %v1345_v14, %v1344_v11 }
 0x257   :  { %1154 = vst [vmem:[#allocation13 + $0x18] sm:$0xff] %v1138_v15  ;;  %1165 = vst [vmem:[#allocation13 + $0x70] sm:$0xff] %v1149_v16  ;;  %v1132_v18 = vadd.f32 %v1346_v17, %v1788_v3 }
 0x259   :  { %v1150_v20 = vmax.f32 %v1132_v18, 0.0 }
 0x25b   :  { %1166 = vst [vmem:[#allocation13 + $0x78] sm:$0xff] %v1150_v20 }
 0x25c   :  { %1595 = shalt.err (!%p1592_p10)
}
 0x25d   :  { %s1621_s15 = smov 128   ;;  %s1622_s16 = smov 8  }
 0x25e   :  { %1178 = dma.vmem_to_hbm [thread:$0]  %s1173_s13, 2048, %s1814_s5, [#allocation7], %s1621_s15, %s1621_s15, %s1622_s16  }
 0x25f   :  { %1610 = dma.done.wait [#allocation7], 2048  }
 0x260   :  { %1611 = vsyncadd [#allocation7], 4294965248 }
 0x261   :  { %1182 = vsyncpa [#allocation6], 1 }
 0x262   :  { %1183 = vsyncpa [#allocation9], 1 }
 0x263   :  { %1184 = vsyncpa [#allocation12], 1 }
 0x264   :  { %1185 = vsyncpa [#allocation7], 1 }

</bundles_post_ra>
